<compile_context>
chip_gen: v6e
topology: v6e:2x2x1
jax: 0.10.0
libtpu: 0.0.40
codegen_flags: <defaults>
</compile_context>

<pallas_src>
import functools

import jax
import jax.numpy as jnp
from jax.experimental import pallas as pl
from jax.experimental.pallas import tpu as pltpu


def _actor_kernel(x_ref, w1_ref, b1_ref, w2_ref, b2_ref, o_ref):
    """One grid step computes one (B, tn) tile of the output.

    Layer 1 (d_in x H, tiny) is recomputed per step so all steps are fully
    independent: no scratch, no init ordering, output axis stays 'parallel'.
    Inputs x/W1/W2 are bf16; accumulation is f32 on the MXU.
    """
    h = jnp.maximum(
        jnp.dot(x_ref[...], w1_ref[...], preferred_element_type=jnp.float32)
        + b1_ref[...],
        0.0,
    )
    out = (
        jnp.dot(h.astype(jnp.bfloat16), w2_ref[...],
                preferred_element_type=jnp.float32)
        + b2_ref[...]
    )
    o_ref[...] = jnp.maximum(out, 0.0)


def _round_up(x, m):
    return ((x + m - 1) // m) * m


@jax.jit
def all_kc_discrete_actor_forward(obs, w1, b1, w2, b2):
    """obs: (B, D_in) f32; w1: (D_in, H); b1: (H,); w2: (H, N); b2: (N,).

    Returns relu(relu(obs @ w1 + b1) @ w2 + b2) of shape (B, N), f32.
    """
    B, d_in = obs.shape
    H = w1.shape[1]
    N = w2.shape[1]

    # ---- Output tiling from a VMEM budget (generation-safe) ----------------
    # Streamed per step (double-buffered by the Pallas pipeline):
    #   W2 tile (H, tn) bf16  +  b2 tile (1, tn) f32  +  out tile (B, tn) f32
    n_lane = _round_up(N, 128)
    tile_budget_bytes = 12 * 1024 * 1024          # fits v5e/v6e/v7x comfortably
    per_lane_bytes = 2 * (2 * H + 4 + 4 * B)      # 2 buffers x bytes per output column
    tn_cap = min(8192, max(128, (tile_budget_bytes // per_lane_bytes) // 128 * 128))

    num_steps = pl.cdiv(n_lane, tn_cap)           # balanced steps (v7x 2-TC friendly)
    tn = _round_up(pl.cdiv(n_lane, num_steps), 128)
    n_pad = num_steps * tn

    if n_pad != N:
        w2 = jnp.pad(w2, ((0, 0), (0, n_pad - N)))
        b2 = jnp.pad(b2, (0, n_pad - N))

    # bf16 streaming for the matmul operands; biases / accumulation stay f32.
    obs_bf = obs.astype(jnp.bfloat16)
    w1_bf = w1.astype(jnp.bfloat16)
    w2_bf = w2.astype(jnp.bfloat16)
    b1_2d = b1.reshape(1, H).astype(jnp.float32)
    b2_2d = b2.reshape(1, n_pad).astype(jnp.float32)

    cost = pl.CostEstimate(
        flops=2 * B * (d_in * H + H * n_pad),
        transcendentals=0,
        bytes_accessed=(
            2 * (B * d_in + d_in * H + H * n_pad)   # bf16 operands
            + 4 * (H + n_pad + B * n_pad)           # f32 biases + output
        ),
    )

    out = pl.pallas_call(
        _actor_kernel,
        out_shape=jax.ShapeDtypeStruct((B, n_pad), jnp.float32),
        grid_spec=pltpu.PrefetchScalarGridSpec(
            num_scalar_prefetch=0,
            grid=(num_steps,),
            in_specs=[
                pl.BlockSpec((B, d_in), lambda j: (0, 0)),   # obs  (grid-invariant)
                pl.BlockSpec((d_in, H), lambda j: (0, 0)),   # W1   (grid-invariant)
                pl.BlockSpec((1, H), lambda j: (0, 0)),      # b1   (grid-invariant)
                pl.BlockSpec((H, tn), lambda j: (0, j)),     # W2   streamed tile
                pl.BlockSpec((1, tn), lambda j: (0, j)),     # b2   streamed tile
            ],
            out_specs=pl.BlockSpec((B, tn), lambda j: (0, j)),
        ),
        compiler_params=pltpu.CompilerParams(
            # Independent steps -> shardable across v7x's two TensorCores;
            # harmless no-op on v5e/v6e.
            dimension_semantics=("parallel",),
            # Explicit cap: above v5e's 16 MiB default, within v7x's 64 MiB
            # physical and equal to its 32 MiB default scoped limit.
            vmem_limit_bytes=32 * 1024 * 1024,
        ),
        cost_estimate=cost,
    )(obs_bf, w1_bf, b1_2d, w2_bf, b2_2d)

    if n_pad != N:
        # Only emitted when num_questions is not 128-aligned (cheap: B x pad).
        out = out[:, :N]
    return out


def all_kc_discrete_actor(obs, w1, b1, w2, b2, state=None):
    """Mirrors AllKCDiscreteActor.forward: returns (output, state)."""
    return all_kc_discrete_actor_forward(obs, w1, b1, w2, b2), state


def reference_forward(obs, w1, b1, w2, b2):
    """Same math as the kernel (bf16 operands, f32 accumulation) in plain JAX."""
    h = jnp.maximum(
        jnp.dot(obs.astype(jnp.bfloat16), w1.astype(jnp.bfloat16),
                preferred_element_type=jnp.float32) + b1,
        0.0,
    )
    out = jnp.dot(h.astype(jnp.bfloat16), w2.astype(jnp.bfloat16),
                  preferred_element_type=jnp.float32) + b2
    return jnp.maximum(out, 0.0)


if __name__ == "__main__":
    # Small shapes consistent with the module's forward:
    #   batch=8, student_hidden_size=32, hidden_size=32, num_questions=256
    B, D_IN, HID, NQ = 8, 32, 32, 256

    key = jax.random.PRNGKey(0)
    k_obs, k_w1, k_b1, k_w2, k_b2 = jax.random.split(key, 5)

    obs = jax.random.normal(k_obs, (B, D_IN), dtype=jnp.float32)
    # Deterministic synthetic parameters (uniform, roughly Kaiming-scaled).
    w1 = jax.random.uniform(k_w1, (D_IN, HID), jnp.float32,
                            minval=-1.0, maxval=1.0) / jnp.sqrt(D_IN)
    b1 = jax.random.uniform(k_b1, (HID,), jnp.float32,
                            minval=-1.0, maxval=1.0) / jnp.sqrt(D_IN)
    w2 = jax.random.uniform(k_w2, (HID, NQ), jnp.float32,
                            minval=-1.0, maxval=1.0) / jnp.sqrt(HID)
    b2 = jax.random.uniform(k_b2, (NQ,), jnp.float32,
                            minval=-1.0, maxval=1.0) / jnp.sqrt(HID)

    out, state = all_kc_discrete_actor(obs, w1, b1, w2, b2, state=None)
    out = jax.block_until_ready(out)

    ref = reference_forward(obs, w1, b1, w2, b2)
    ref_f32 = jnp.maximum(jnp.maximum(obs @ w1 + b1, 0.0) @ w2 + b2, 0.0)

    assert out.shape == (B, NQ)
    assert state is None  # state passes through untouched, as in the module
    # Exact-math check vs. the bf16-operand reference, loose check vs. full f32.
    assert jnp.allclose(out, ref, atol=1e-3, rtol=1e-3)
    assert jnp.allclose(out, ref_f32, atol=3e-2, rtol=3e-2)

    print("KERNEL_OK")
</pallas_src>

<mosaic_0001>
module attributes {stable_mosaic.version = 11 : i64} {
  func.func @_actor_kernel(%arg0: i32, %arg1: memref<8x32xbf16, #tpu.memory_space<vmem>>, %arg2: memref<32x32xbf16, #tpu.memory_space<vmem>>, %arg3: memref<1x32xf32, #tpu.memory_space<vmem>>, %arg4: memref<32x256xbf16, #tpu.memory_space<vmem>>, %arg5: memref<1x256xf32, #tpu.memory_space<vmem>>, %arg6: memref<8x256xf32, #tpu.memory_space<vmem>>) attributes {dimension_semantics = [#tpu.dimension_semantics<parallel>], iteration_bounds = array<i64: 1>, scalar_prefetch = 0 : i64, scratch_operands = 0 : i64, tpu.core_type = #tpu.core_type<tc>, window_params = [{pipeline_mode = #tpu.pipeline_mode<synchronous>, transform_indices = @transform_0, window_bounds = array<i64: 8, 32>}, {pipeline_mode = #tpu.pipeline_mode<synchronous>, transform_indices = @transform_1, window_bounds = array<i64: 32, 32>}, {pipeline_mode = #tpu.pipeline_mode<synchronous>, transform_indices = @transform_2, window_bounds = array<i64: 1, 32>}, {transform_indices = @transform_3, window_bounds = array<i64: 32, 256>}, {transform_indices = @transform_4, window_bounds = array<i64: 1, 256>}, {transform_indices = @transform_5, window_bounds = array<i64: 8, 256>}]} {
    %c0 = arith.constant 0 : index
    %c0_0 = arith.constant 0 : index
    %0 = vector.load %arg1[%c0, %c0_0] : memref<8x32xbf16, #tpu.memory_space<vmem>>, vector<8x32xbf16>
    %c0_1 = arith.constant 0 : index
    %c0_2 = arith.constant 0 : index
    %1 = vector.load %arg2[%c0_1, %c0_2] : memref<32x32xbf16, #tpu.memory_space<vmem>>, vector<32x32xbf16>
    %cst = arith.constant dense<0.000000e+00> : vector<8x32xf32>
    %2 = tpu.matmul %0, %1, %cst {dimension_numbers = #tpu.dot_dimension_numbers<[1], [0], [0], [1], [0, 0, 1, 1], [], []>} : vector<8x32xbf16>, vector<32x32xbf16>, vector<8x32xf32> -> vector<8x32xf32>
    %c0_3 = arith.constant 0 : index
    %c0_4 = arith.constant 0 : index
    %3 = vector.load %arg3[%c0_3, %c0_4] : memref<1x32xf32, #tpu.memory_space<vmem>>, vector<1x32xf32>
    %4 = vector.broadcast %3 : vector<1x32xf32> to vector<8x32xf32>
    %5 = arith.addf %2, %4 : vector<8x32xf32>
    %cst_5 = arith.constant 0.000000e+00 : f32
    %6 = vector.broadcast %cst_5 : f32 to vector<8x32xf32>
    %7 = arith.maximumf %5, %6 : vector<8x32xf32>
    %8 = arith.truncf %7 : vector<8x32xf32> to vector<8x32xbf16>
    %c0_6 = arith.constant 0 : index
    %c0_7 = arith.constant 0 : index
    %9 = vector.load %arg4[%c0_6, %c0_7] : memref<32x256xbf16, #tpu.memory_space<vmem>>, vector<32x256xbf16>
    %cst_8 = arith.constant dense<0.000000e+00> : vector<8x256xf32>
    %10 = tpu.matmul %8, %9, %cst_8 {dimension_numbers = #tpu.dot_dimension_numbers<[1], [0], [0], [1], [0, 0, 1, 1], [], []>} : vector<8x32xbf16>, vector<32x256xbf16>, vector<8x256xf32> -> vector<8x256xf32>
    %c0_9 = arith.constant 0 : index
    %c0_10 = arith.constant 0 : index
    %11 = vector.load %arg5[%c0_9, %c0_10] : memref<1x256xf32, #tpu.memory_space<vmem>>, vector<1x256xf32>
    %12 = vector.broadcast %11 : vector<1x256xf32> to vector<8x256xf32>
    %13 = arith.addf %10, %12 : vector<8x256xf32>
    %cst_11 = arith.constant 0.000000e+00 : f32
    %14 = vector.broadcast %cst_11 : f32 to vector<8x256xf32>
    %15 = arith.maximumf %13, %14 : vector<8x256xf32>
    %c0_12 = arith.constant 0 : index
    %c0_13 = arith.constant 0 : index
    %16 = vector.load %arg6[%c0_12, %c0_13] : memref<8x256xf32, #tpu.memory_space<vmem>>, vector<8x256xf32>
    tpu.vector_store %arg6[%c0_12, %c0_13], %15 {strides = array<i32>} : memref<8x256xf32, #tpu.memory_space<vmem>>, vector<8x256xf32>,
    return
  }
  func.func @transform_0(%arg0: i32) -> (i32, i32) {
    %c0_i32 = arith.constant 0 : i32
    %c0_i32_0 = arith.constant 0 : i32
    %c0_i32_1 = arith.constant 0 : i32
    return %c0_i32, %c0_i32_0 : i32, i32
  }
  func.func @transform_1(%arg0: i32) -> (i32, i32) {
    %c0_i32 = arith.constant 0 : i32
    %c0_i32_0 = arith.constant 0 : i32
    %c0_i32_1 = arith.constant 0 : i32
    return %c0_i32, %c0_i32_0 : i32, i32
  }
  func.func @transform_2(%arg0: i32) -> (i32, i32) {
    %c0_i32 = arith.constant 0 : i32
    %c0_i32_0 = arith.constant 0 : i32
    %c0_i32_1 = arith.constant 0 : i32
    return %c0_i32, %c0_i32_0 : i32, i32
  }
  func.func @transform_3(%arg0: i32) -> (i32, i32) {
    %c0_i32 = arith.constant 0 : i32
    %c0_i32_0 = arith.constant 0 : i32
    return %c0_i32, %arg0 : i32, i32
  }
  func.func @transform_4(%arg0: i32) -> (i32, i32) {
    %c0_i32 = arith.constant 0 : i32
    %c0_i32_0 = arith.constant 0 : i32
    return %c0_i32, %arg0 : i32, i32
  }
  func.func @transform_5(%arg0: i32) -> (i32, i32) {
    %c0_i32 = arith.constant 0 : i32
    %c0_i32_0 = arith.constant 0 : i32
    return %c0_i32, %arg0 : i32, i32
  }
}

</mosaic_0001>

<bundles_post_ra>
// kernel: all_kc_discrete_actor_forward.1
= control target key start
LH: loop header
LB: loop body
LE: loop exit
PB: predicated region body
PF: predicated region fallthrough
CT: control target
= control target key end

     0   :  { %v244_v1 = vmov 0.0   ;;  %vm245_vm0 = vmmov 0   ;;  %s310_s0 = inlined_call_operand.vmem [shape: bf16[8,32], index: 0, kind: input, shape index: {}]   ;;  %s311_s1 = inlined_call_operand.vmem [shape: bf16[32,32], index: 1, kind: input, shape index: {}]   ;;  %s312_s2 = inlined_call_operand.vmem [shape: f32[1,32], index: 2, kind: input, shape index: {}]   ;;  %s313_s3 = inlined_call_operand.vmem [shape: bf16[32,256], index: 3, kind: input, shape index: {}]   ;;  %s314_s4 = inlined_call_operand.vmem [shape: f32[1,256], index: 4, kind: input, shape index: {}]   ;;  %s315_s5 = inlined_call_operand.hbm [shape: f32[8,256], index: 5, kind: output, shape index: {}]  }
   0x1   :  { %v214_v0 = vld [vmem:[%s311_s1 + $0x8] sm:$0xff]   ;;  %202 = vmatprep.subr.bf16.mxu0 %v244_v1  ;;  %v215_v2 = vld [vmem:[%s311_s1] sm:$0xff]   ;;  %206 = vmatprep.mubr.msk.bf16.mxu0 %vm245_vm0, %v244_v1  ;;  %v216_v3 = vld [vmem:[%s313_s3 + $0x14] ss:$8 sps:$4 sm:$0xff]  }
   0x2   :  { %203 = vmatpush3.bf16.msra.mxu0 %v214_v0 }
   0x3   :  { %204 = vmatprep.subr.bf16.mxu0 %v244_v1 }
   0x4   :  { %10 = vsyncpa [#allocation3], 0  ;;  %143 = vmatprep.subr.bf16.mxu1 %v216_v3  ;;  %v22_v4 = vld [vmem:[%s310_s0] sm:$0xf]  ;;  %vm46_vm1 = vcmask 261120   ;;  %v246_v8 = vmov 0   ;;  %v98_v17 = vlaneseq }
   0x5   :  { %v218_v5 = vld [vmem:[%s313_s3 + $0x10] ss:$8 sps:$4 sm:$0xff]   ;;  %v219_v6 = vld [vmem:[%s313_s3 + $0x4] ss:$8 sps:$4 sm:$0xff]   ;;  %v221_v7 = vld [vmem:[%s313_s3] ss:$8 sps:$4 sm:$0xff]   ;;  %163 = vmatprep.mubr.bf16.mxu1 %v246_v8 }
   0x6   :  { %205 = vmatpush3.bf16.msra.mxu0 %v215_v2  ;;  %144 = vmatpush1.bf16.msra.mxu1 %v218_v5  ;;  %v190_v9 = vld [vmem:[%s312_s2] ss:$0 sm:$0xff]  ;;  %v99_v18 = vshrl.u32 %v98_v17, 7  ;;  %s247_s2 = smov [#allocation2]  }
   0x7   :  { %145 = vmatprep.subr.bf16.mxu1 %v219_v6  ;;  %v96_v20 = vld [vmem:[%s314_s4] sm:$0x3]  ;;  %s182_s8 = sshll.u32 %s247_s2, 4  ;;  %s183_s8 = int_to_ptr.vmem [resolvable:$true] %s182_s8 }
   0x8   :  { %v100_v19 = vsub.s32 0, %v99_v18  ;;  %v104_v21 = vsub.s32 1, %v99_v18  ;;  %s222_s9 = scalar_lea.vmem %s183_s8, 256  ;;  %p227_p1 = scmp.lt.s32.totalorder %s183_s8, %s183_s8 }
   0x9   :  { %207 = vmatmul.mubr.msk.bf16.vlgmr.msra.gmra.mxu0 %vm46_vm1, %v22_v4  ;;  %p223_p0 = scmp.ne.s32.totalorder %s183_s8, %s222_s9  ;;  %p228_p2 = scmp.lt.s32.totalorder %s222_s9, %s222_s9 }
   0xa   :  { %146 = vmatpush1.bf16.msra.mxu1 %v221_v7  ;;  %v101_v22 = vrot.slane %v96_v20, %v100_v19  ;;  %v105_v23 = vrot.slane %v96_v20, %v104_v21 }
   0xb   :  { %p229_p3 = por %p228_p2, %p227_p1 }
   0xd   :  { %p230_p4 = pnand %p229_p3, %p223_p0 }
  0xc9   :  { %v84_v10 = vpop.f32.mrf.mxu0 }
  0xca   :  { %v85_v11 = vadd.f32 %v190_v9, %v84_v10 }
  0xcb   :  { %v208_v12 = vpop.f32.mrf.mxu0 }
  0xcc   :  { %v90_v13 = vmax.f32 %v85_v11, 0.0 }
  0xcd   :  { %v87_v14 = vpop.f32.mrf.mxu0 }
  0xce   :  { %v91_v15 = vpack.c.bf16 %v90_v13, %v90_v13 }
  0xcf   :  { %v209_v16 = vpop.f32.mrf.mxu0 }
  0xd0   :  { %198 = vmatmul.mubr.msk.bf16.vlgmr.msra.gmra.mxu1 %vm46_vm1, %v91_v15 }
 0x190   :  { %v165_v24 = vpop.f32.mrf.mxu1 }
 0x191   :  { %v166_v25 = vadd.f32 %v165_v24, %v101_v22 }
 0x192   :  { %v167_v26 = vpop.f32.mrf.mxu1 }
 0x193   :  { %v172_v27 = vmax.f32 %v166_v25, 0.0  ;;  %v168_v28 = vadd.f32 %v167_v26, %v105_v23 }
 0x194   :  { %v169_v29 = vpop.f32.mrf.mxu1 }
 0x195   :  { %174 = vst [vmem:[#allocation2] sm:$0xff] %v172_v27  ;;  %v173_v30 = vmax.f32 %v168_v28, 0.0 }
 0x196   :  { %v170_v31 = vpop.f32.mrf.mxu1 }
 0x197   :  { %175 = vst [vmem:[#allocation2 + $0x8] sm:$0xff] %v173_v30 }
 0x198   :  { %233 = shalt.err (!%p230_p4)
}
 0x199   :  { %185 = dma.vmem_to_hbm [thread:$0]  %s183_s8, 256, %s315_s5, [#allocation3]  }
 0x19a   :  { %242 = dma.done.wait [#allocation3], 256  }
 0x19b   :  { %243 = vsyncadd [#allocation3], 4294967040 }
 0x19c   :  { %189 = vsyncpa [#allocation3], 1 }

</bundles_post_ra>
